<compile_context>
chip_gen: v7x
topology: tpu7x:2x2x1
jax: 0.10.0
libtpu: 0.0.40
codegen_flags: <defaults>
</compile_context>

<pallas_src>
import functools

import jax
import jax.numpy as jnp
from jax.experimental import pallas as pl
from jax.experimental.pallas import tpu as pltpu


def _round_up(x, m):
    return ((x + m - 1) // m) * m


def _het_linear_kernel(x_ref, w_ref, b_ref, o_ref, acc_ref):
    # x_ref: (tm, tk), w_ref: (tk, tn), b_ref: (1, tn),
    # o_ref: (tm, tn), acc_ref: (tm, tn) float32 scratch.
    k = pl.program_id(3)

    @pl.when(k == 0)
    def _():
        acc_ref[...] = jnp.zeros_like(acc_ref)

    acc_ref[...] += jnp.dot(
        x_ref[...], w_ref[...], preferred_element_type=jnp.float32
    )

    @pl.when(k == pl.num_programs(3) - 1)
    def _():
        o_ref[...] = (acc_ref[...] + b_ref[...].astype(jnp.float32)).astype(
            o_ref.dtype
        )


@functools.partial(jax.jit, static_argnames=("tm", "tn", "tk"))
def het_linear_stacked(x, w, b, *, tm=512, tn=256, tk=512):
    """x: [T, N, F], w: [T, F, D], b: [T, 1, D] -> [T, N, D]."""
    T, N, F = x.shape
    D = w.shape[-1]

    # Clamp tiles to the (aligned) problem size, then pad the operands so every
    # tile divides exactly.  Rows align to 8 (sublane); D and F align to 128
    # (lane) so output stores and MXU K loads are lane-dense.  Zero padding of
    # the contraction dim (F) keeps the matmul exact.
    tm = min(tm, _round_up(N, 8))
    tn = min(tn, _round_up(D, 128))
    tk = min(tk, _round_up(F, 128))
    n_p = _round_up(N, tm)
    d_p = _round_up(D, tn)
    f_p = _round_up(F, tk)
    if (n_p, f_p) != (N, F):
        x = jnp.pad(x, ((0, 0), (0, n_p - N), (0, f_p - F)))
    if (f_p, d_p) != (F, D):
        w = jnp.pad(w, ((0, 0), (0, f_p - F), (0, d_p - D)))
    if d_p != D:
        b = jnp.pad(b, ((0, 0), (0, 0), (0, d_p - D)))

    grid = (T, d_p // tn, n_p // tm, f_p // tk)
    bytes_el = x.dtype.itemsize
    cost = pl.CostEstimate(
        flops=2 * T * n_p * f_p * d_p,
        transcendentals=0,
        bytes_accessed=bytes_el
        * (T * n_p * f_p + T * f_p * d_p + T * d_p + T * n_p * d_p),
    )

    out = pl.pallas_call(
        _het_linear_kernel,
        out_shape=jax.ShapeDtypeStruct((T, n_p, d_p), x.dtype),
        grid_spec=pltpu.PrefetchScalarGridSpec(
            num_scalar_prefetch=0,
            grid=grid,
            in_specs=[
                # x tile: changes with row-tile i and K-tile k only.
                pl.BlockSpec((pl.Squeezed(), tm, tk), lambda t, j, i, k: (t, i, k)),
                # weight slab: constant across the row-tile axis i -> reused
                # for every row tile of the current node type / D tile.
                pl.BlockSpec((pl.Squeezed(), tk, tn), lambda t, j, i, k: (t, k, j)),
                pl.BlockSpec((pl.Squeezed(), 1, tn), lambda t, j, i, k: (t, 0, j)),
            ],
            out_specs=pl.BlockSpec(
                (pl.Squeezed(), tm, tn), lambda t, j, i, k: (t, i, j)
            ),
            scratch_shapes=[pltpu.VMEM((tm, tn), jnp.float32)],
        ),
        compiler_params=pltpu.CompilerParams(
            # Reduction (K) axis last and "arbitrary"; the rest "parallel" so
            # the 2 TensorCores on v7x can shard over T / D-tiles / row-tiles.
            dimension_semantics=("parallel", "parallel", "parallel", "arbitrary"),
            # Safe on all generations (<= v6e/v7x scoped default, raises v5e's
            # 16 MiB default); our tiles use only ~4-5 MiB.
            vmem_limit_bytes=32 * 1024 * 1024,
        ),
        cost_estimate=cost,
    )(x, w, b)
    return out[:, :N, :D]


def het_linear(x_dict, weights, biases, *, tm=512, tn=256, tk=512):
    """Mimics HetLinear.forward: applies lin[i] to the i-th dict entry.

    x_dict: {key: [N_i, F]} (per-type row counts may differ).
    weights: [T, F, D] (pre-transposed), biases: [T, D].
    Returns {key: [N_i, D]} in the same key order.
    """
    keys = list(x_dict.keys())
    ns = [int(x_dict[k].shape[0]) for k in keys]
    n_max = max(ns)
    # TODO(synk): replace pad-to-max-N stacking with a ragged grouped-matmul
    # (scalar-prefetch row offsets, MoE-style) to avoid work on padded rows
    # when node-type populations are highly skewed.
    x_stacked = jnp.stack(
        [jnp.pad(x_dict[k], ((0, n_max - n), (0, 0))) for k, n in zip(keys, ns)],
        axis=0,
    )  # [T, n_max, F]
    b = biases[:, None, :]  # [T, 1, D]
    out = het_linear_stacked(x_stacked, weights, b, tm=tm, tn=tn, tk=tk)
    return {k: out[i, : ns[i], :] for i, k in enumerate(keys)}


def init_params(key, node_types, in_features, out_dim, dtype=jnp.float32):
    """Deterministic parameter init (uniform, like nn.Linear's scheme)."""
    kw, kb = jax.random.split(key)
    bound = 1.0 / jnp.sqrt(jnp.float32(in_features))
    # W stored pre-transposed as [T, F, D] so the kernel does x @ W.
    w = jax.random.uniform(
        kw, (node_types, in_features, out_dim), dtype, -bound, bound
    )
    b = jax.random.uniform(kb, (node_types, out_dim), dtype, -bound, bound)
    return w, b


if __name__ == "__main__":
    node_types = 4
    in_features = 32
    out_dim = 128
    type_names = ["author", "paper", "venue", "term"]
    rows_per_type = [8, 16, 12, 8]   # ragged per-type node counts

    key = jax.random.PRNGKey(0)
    kparams, kx = jax.random.split(key)
    w, b = init_params(kparams, node_types, in_features, out_dim)

    xkeys = jax.random.split(kx, node_types)
    x_dict = {
        name: jax.random.normal(
            xkeys[i], (rows_per_type[i], in_features), jnp.float32
        )
        for i, name in enumerate(type_names)
    }

    out_dict = het_linear(x_dict, w, b)
    for v in out_dict.values():
        jax.block_until_ready(v)

    # Reference check in plain JAX (same math as nn.Linear per node type).
    ok = True
    for i, name in enumerate(type_names):
        ref = x_dict[name] @ w[i] + b[i]
        ok &= bool(jnp.allclose(out_dict[name], ref, rtol=1e-5, atol=1e-5))
        ok &= out_dict[name].shape == (rows_per_type[i], out_dim)

    print("KERNEL_OK" if ok else "KERNEL_MISMATCH")
</pallas_src>

<mosaic_0001>
module attributes {stable_mosaic.version = 11 : i64} {
  func.func @_het_linear_kernel(%arg0: i32, %arg1: i32, %arg2: i32, %arg3: i32, %arg4: memref<1x16x128xf32, #tpu.memory_space<vmem>>, %arg5: memref<1x128x128xf32, #tpu.memory_space<vmem>>, %arg6: memref<1x1x128xf32, #tpu.memory_space<vmem>>, %arg7: memref<1x16x128xf32, #tpu.memory_space<vmem>>, %arg8: memref<16x128xf32, #tpu.memory_space<vmem>>) attributes {dimension_semantics = [#tpu.dimension_semantics<parallel>, #tpu.dimension_semantics<parallel>, #tpu.dimension_semantics<parallel>, #tpu.dimension_semantics<arbitrary>], iteration_bounds = array<i64: 4, 1, 1, 1>, scalar_prefetch = 0 : i64, scratch_operands = 1 : i64, tpu.core_type = #tpu.core_type<tc>, window_params = [{transform_indices = @transform_0, window_bounds = array<i64: 1, 16, 128>}, {transform_indices = @transform_1, window_bounds = array<i64: 1, 128, 128>}, {transform_indices = @transform_2, window_bounds = array<i64: 1, 1, 128>}, {transform_indices = @transform_3, window_bounds = array<i64: 1, 16, 128>}]} {
    %c0_i32 = arith.constant 0 : i32
    %0 = arith.cmpi eq, %arg3, %c0_i32 : i32
    %1 = arith.extui %0 : i1 to i32
    %c0_i32_0 = arith.constant 0 : i32
    %2 = arith.cmpi ne, %1, %c0_i32_0 : i32
    scf.if %2 {
      %cst_12 = arith.constant 0.000000e+00 : f32
      %14 = vector.broadcast %cst_12 : f32 to vector<16x128xf32>
      %c0_13 = arith.constant 0 : index
      %c0_14 = arith.constant 0 : index
      %15 = vector.load %arg8[%c0_13, %c0_14] : memref<16x128xf32, #tpu.memory_space<vmem>>, vector<16x128xf32>
      tpu.vector_store %arg8[%c0_13, %c0_14], %14 {strides = array<i32>} : memref<16x128xf32, #tpu.memory_space<vmem>>, vector<16x128xf32>,
    } else {
    }
    %c0 = arith.constant 0 : index
    %c0_1 = arith.constant 0 : index
    %3 = vector.load %arg8[%c0, %c0_1] : memref<16x128xf32, #tpu.memory_space<vmem>>, vector<16x128xf32>
    %c0_2 = arith.constant 0 : index
    %c0_3 = arith.constant 0 : index
    %c0_4 = arith.constant 0 : index
    %4 = vector.load %arg4[%c0_2, %c0_3, %c0_4] : memref<1x16x128xf32, #tpu.memory_space<vmem>>, vector<1x16x128xf32>
    %5 = vector.shape_cast %4 : vector<1x16x128xf32> to vector<16x128xf32>
    %c0_5 = arith.constant 0 : index
    %c0_6 = arith.constant 0 : index
    %c0_7 = arith.constant 0 : index
    %6 = vector.load %arg5[%c0_5, %c0_6, %c0_7] : memref<1x128x128xf32, #tpu.memory_space<vmem>>, vector<1x128x128xf32>
    %7 = vector.shape_cast %6 : vector<1x128x128xf32> to vector<128x128xf32>
    %cst = arith.constant dense<0.000000e+00> : vector<16x128xf32>
    %8 = tpu.matmul %5, %7, %cst {dimension_numbers = #tpu.dot_dimension_numbers<[1], [0], [0], [1], [0, 0, 1, 1], [], []>} : vector<16x128xf32>, vector<128x128xf32>, vector<16x128xf32> -> vector<16x128xf32>
    %9 = arith.addf %3, %8 : vector<16x128xf32>
    %c0_8 = arith.constant 0 : index
    %c0_9 = arith.constant 0 : index
    %10 = vector.load %arg8[%c0_8, %c0_9] : memref<16x128xf32, #tpu.memory_space<vmem>>, vector<16x128xf32>
    tpu.vector_store %arg8[%c0_8, %c0_9], %9 {strides = array<i32>} : memref<16x128xf32, #tpu.memory_space<vmem>>, vector<16x128xf32>,
    %c0_i32_10 = arith.constant 0 : i32
    %11 = arith.cmpi eq, %arg3, %c0_i32_10 : i32
    %12 = arith.extui %11 : i1 to i32
    %c0_i32_11 = arith.constant 0 : i32
    %13 = arith.cmpi ne, %12, %c0_i32_11 : i32
    scf.if %13 {
      %c0_12 = arith.constant 0 : index
      %c0_13 = arith.constant 0 : index
      %14 = vector.load %arg8[%c0_12, %c0_13] : memref<16x128xf32, #tpu.memory_space<vmem>>, vector<16x128xf32>
      %c0_14 = arith.constant 0 : index
      %c0_15 = arith.constant 0 : index
      %c0_16 = arith.constant 0 : index
      %15 = vector.load %arg6[%c0_14, %c0_15, %c0_16] : memref<1x1x128xf32, #tpu.memory_space<vmem>>, vector<1x1x128xf32>
      %16 = vector.shape_cast %15 : vector<1x1x128xf32> to vector<1x128xf32>
      %17 = vector.broadcast %16 : vector<1x128xf32> to vector<16x128xf32>
      %18 = arith.addf %14, %17 : vector<16x128xf32>
      %c0_17 = arith.constant 0 : index
      %c0_18 = arith.constant 0 : index
      %c0_19 = arith.constant 0 : index
      %19 = vector.load %arg7[%c0_17, %c0_18, %c0_19] : memref<1x16x128xf32, #tpu.memory_space<vmem>>, vector<1x16x128xf32>
      %20 = vector.shape_cast %19 : vector<1x16x128xf32> to vector<16x128xf32>
      %21 = vector.shape_cast %18 : vector<16x128xf32> to vector<1x16x128xf32>
      tpu.vector_store %arg7[%c0_17, %c0_18, %c0_19], %21 {strides = array<i32>} : memref<1x16x128xf32, #tpu.memory_space<vmem>>, vector<1x16x128xf32>,
    } else {
    }
    return
  }
  func.func @transform_0(%arg0: i32, %arg1: i32, %arg2: i32, %arg3: i32) -> (i32, i32, i32) {
    %c0_i32 = arith.constant 0 : i32
    return %arg0, %arg2, %arg3 : i32, i32, i32
  }
  func.func @transform_1(%arg0: i32, %arg1: i32, %arg2: i32, %arg3: i32) -> (i32, i32, i32) {
    %c0_i32 = arith.constant 0 : i32
    return %arg0, %arg3, %arg1 : i32, i32, i32
  }
  func.func @transform_2(%arg0: i32, %arg1: i32, %arg2: i32, %arg3: i32) -> (i32, i32, i32) {
    %c0_i32 = arith.constant 0 : i32
    %c0_i32_0 = arith.constant 0 : i32
    return %arg0, %c0_i32, %arg1 : i32, i32, i32
  }
  func.func @transform_3(%arg0: i32, %arg1: i32, %arg2: i32, %arg3: i32) -> (i32, i32, i32) {
    %c0_i32 = arith.constant 0 : i32
    return %arg0, %arg2, %arg1 : i32, i32, i32
  }
}

</mosaic_0001>

<bundles_post_ra>
// kernel: het_linear_stacked.1
= control target key start
LH: loop header
LB: loop body
LE: loop exit
PB: predicated region body
PF: predicated region fallthrough
CT: control target
= control target key end

     0   :  { %8 = vsyncpa [#allocation4], 0  ;;  %s971_s0 = inlined_call_operand.vmem [shape: f32[4,16,128], index: 0, kind: input, shape index: {}]   ;;  %s972_s1 = inlined_call_operand.vmem [shape: f32[4,128,128], index: 1, kind: input, shape index: {}]   ;;  %s973_s2 = inlined_call_operand.vmem [shape: f32[4,1,128], index: 2, kind: input, shape index: {}]   ;;  %s974_s3 = inlined_call_operand.hbm [shape: f32[4,16,128], index: 3, kind: output, shape index: {}]  }
   0x1   :  { %10 = vsyncpa [#allocation4 + $0x1], 0  ;;  %s823_s12 = smov 0   ;;  %s825_s13 = smov 0  }
   0x2   :  { %s827_s14 = smov 0   ;;  %s829_s15 = smov 0  }
   0x3   :  { %s831_s16 = smov 0   ;;  %s833_s17 = smov 0  }
   0x4 LB: > { %s559_s18 = sadd.s32 4294967295, %s798_s17   ;;  %s560_s19 = sadd.s32 4294967294, %s798_s17   ;;  %s798_s17 = sphi %s833_s17, %s16_s17   ;;  %s794_s16 = sphi %s831_s16, %s981_s16   ;;  %s790_s15 = sphi %s829_s15, %s980_s15   ;;  %s786_s14 = sphi %s827_s14, %s979_s14   ;;  %s782_s13 = sphi %s825_s13, %s978_s13   ;;  %s778_s12 = sphi %s823_s12, %s977_s12  }
   0x5   : > { %s42_s20 = sadd.s32 1, %s794_s16  ;;  %s141_s21 = sadd.s32 1, %s786_s14 }
   0x6   : > { %p44_p0 = scmp.ge.s32.totalorder %s42_s20, 4  ;;  %p151_p1 = scmp.ne.s32.totalorder %s786_s14, %s782_s13 }
   0x7   : > { %p152_p2 = scmp.eq.s32.totalorder %s559_s18, 3  ;;  %p157_p3 = scmp.ne.s32.totalorder %s782_s13, %s778_s12 }
   0x8   : > { %s983_s20 = smov (%p44_p0, %s42_s20), 0  ;;  %p158_p5 = scmp.eq.s32.totalorder %s560_s19, 3 }
   0x9   : > { %p863_p4 = por %p152_p2, %p151_p1  ;;  %s134_s23 = ssub.s32 %s794_s16, %s983_s20 }
   0xa   : > { %p563_p6 = scmp.ge.s32.totalorder %s798_s17, 1  ;;  %p139_p7 = scmp.eq.s32.totalorder %s134_s23, 0 }
   0xb   : > { %p870_p8 = por %p158_p5, %p157_p3  ;;  %p217_p9 = scmp.lt.s32.totalorder %s798_s17, 5 }
   0xc   : > { %s876_s25 = scalar_select %p139_p7, %s786_s14, %s141_s21  }
   0xd   : > { %p218_p10 = pnand %p563_p6, %p217_p9 }
   0xe   : > { %p267_p11 = scmp.lt.s32.totalorder (!%p218_p10), %s790_s15, 3  ;;  %s263_s8 = sand.u32 (!%p218_p10), 1, %s782_s13  }
   0xf   : > { %221 = sbr.rel (%p218_p10) target bundleno = 291 (0x123), region = 32  ;;  %s564_s9 = sshll.u32 (!%p218_p10), %s263_s8, 4 }
  0x10   : > { %s265_s19 = scalar_lea.vmem (!%p218_p10), [#allocation3], %s564_s9  ;;  %s577_s23 = sshll.u32 (!%p218_p10), %s790_s15, 8 }
  0x11   : > { %s437_s21 = sshll.u32 (!%p218_p10), %s265_s19, 4  ;;  %s923_s29 = scalar_lea.hbm (!%p218_p10), %s974_s3, %s577_s23  ;;  %s918_s21 = int_to_ptr.vmem [resolvable:$true] %s437_s21 }
  0x16   : > { %s880_s26 = scalar_select %p267_p11, %s790_s15, 3 }
  0x17   : > { %s800_s15 = smov [#allocation3]  }
  0x18   : > { %s576_s27 = sshll.u32 %s880_s26, 7  ;;  %s575_s4 = sshll.u32 %s880_s26, 4 }
  0x19   : > { %s886_s30 = scalar_lea.vmem %s972_s1, %s576_s27  ;;  %s898_s7 = scalar_lea.vmem %s971_s0, %s575_s4 }
  0x1a   : > { %v309_v0 = vld [vmem:[%s886_s30] sm:$0xff]  ;;  %v310_v1 = vld [vmem:[%s886_s30 + $0x8] sm:$0xff]  ;;  %v311_v2 = vld [vmem:[%s886_s30 + $0x10] sm:$0xff]  ;;  %s297_s18 = scalar_lea.vmem %s973_s2, %s880_s26  ;;  %s925_s26 = scalar_lea.sflag [#allocation4], %s263_s8 }
  0x1b   : > { %v631_v3 = vpack.c.bf16 %v310_v1, %v309_v0  ;;  %v312_v4 = vld [vmem:[%s886_s30 + $0x18] sm:$0xff]  ;;  %v313_v6 = vld [vmem:[%s886_s30 + $0x20] sm:$0xff]  ;;  %v314_v7 = vld [vmem:[%s886_s30 + $0x28] sm:$0xff]  ;;  %s724_s4 = sshll.u32 %s800_s15, 4  ;;  %s725_s4 = int_to_ptr.vmem [resolvable:$false] %s724_s4 }
  0x1c   : > { %v635_v5 = vpack.c.bf16 %v312_v4, %v311_v2  ;;  %v639_v8 = vpack.c.bf16 %v314_v7, %v313_v6  ;;  %v307_v9 = vld [vmem:[%s898_s7] sm:$0xff]  ;;  %v315_v10 = vld [vmem:[%s886_s30 + $0x30] sm:$0xff]  ;;  %v316_v11 = vld [vmem:[%s886_s30 + $0x38] sm:$0xff]  ;;  %s726_s5 = scalar_lea.vmem %s725_s4, 512  ;;  %p727_p1 = scmp.lt.s32.totalorder %s918_s21, %s725_s4 }
  0x1d   : > { %632 = vmatprep.subr.bf16.mxu0 %v631_v3  ;;  %628 = vmatprep.mubr.f32.mxu0 %v307_v9  ;;  %v643_v12 = vpack.c.bf16 %v316_v11, %v315_v10  ;;  %v317_v13 = vld [vmem:[%s886_s30 + $0x40] sm:$0xff]  ;;  %v318_v14 = vld [vmem:[%s886_s30 + $0x48] sm:$0xff]  ;;  %v319_v16 = vld [vmem:[%s886_s30 + $0x50] sm:$0xff] }
  0x1e   : > { %634 = vmatpush3.bf16.msra.mxu0 %v631_v3  ;;  %v647_v15 = vpack.c.bf16 %v318_v14, %v317_v13  ;;  %v320_v17 = vld [vmem:[%s886_s30 + $0x58] sm:$0xff]  ;;  %v321_v19 = vld [vmem:[%s886_s30 + $0x60] sm:$0xff]  ;;  %v322_v20 = vld [vmem:[%s886_s30 + $0x68] sm:$0xff] }
  0x1f   : > { %636 = vmatprep.subr.bf16.mxu0 %v635_v5  ;;  %v651_v18 = vpack.c.bf16 %v320_v17, %v319_v16  ;;  %v655_v21 = vpack.c.bf16 %v322_v20, %v321_v19  ;;  %v323_v22 = vld [vmem:[%s886_s30 + $0x70] sm:$0xff]  ;;  %v324_v23 = vld [vmem:[%s886_s30 + $0x78] sm:$0xff]  ;;  %v308_v25 = vld [vmem:[%s898_s7 + $0x8] sm:$0xff]  ;;  %s720_s30 = scalar_lea.vmem %s918_s21, 256 }
  0x20   : > { %v659_v24 = vpack.c.bf16 %v324_v23, %v323_v22  ;;  %v569_v26 = vld [vmem:[%s297_s18] ss:$0 sm:$0xff]  ;;  %p721_p12 = scmp.ne.s32.totalorder %s918_s21, %s720_s30  ;;  %p728_p2 = scmp.lt.s32.totalorder %s726_s5, %s720_s30 }
  0x22   : > { %638 = vmatpush3.bf16.msra.mxu0 %v635_v5  ;;  %p722_p13 = pnand %p721_p12, %p863_p4  ;;  %p729_p3 = por %p728_p2, %p727_p1 }
  0x23   : > { %640 = vmatprep.subr.bf16.mxu0 %v639_v8 }
  0x24   : > { %p723_p0 = pneg %p722_p13 }
  0x26   : > { %642 = vmatpush3.bf16.msra.mxu0 %v639_v8  ;;  %p730_p5 = pnand %p729_p3, %p723_p0 }
  0x27   : > { %644 = vmatprep.subr.bf16.mxu0 %v643_v12 }
  0x2a   : > { %646 = vmatpush3.bf16.msra.mxu0 %v643_v12 }
  0x2b   : > { %648 = vmatprep.subr.bf16.mxu0 %v647_v15 }
  0x2e   : > { %650 = vmatpush3.bf16.msra.mxu0 %v647_v15 }
  0x2f   : > { %652 = vmatprep.subr.bf16.mxu0 %v651_v18 }
  0x32   : > { %654 = vmatpush3.bf16.msra.mxu0 %v651_v18 }
  0x33   : > { %656 = vmatprep.subr.bf16.mxu0 %v655_v21 }
  0x36   : > { %658 = vmatpush3.bf16.msra.mxu0 %v655_v21 }
  0x37   : > { %660 = vmatprep.subr.bf16.mxu0 %v659_v24 }
  0x3a   : > { %662 = vmatpush3.bf16.msra.mxu0 %v659_v24 }
  0x3d   : > { %629 = vmatmul.mubr.f32.vlgmr.msra.gmra.mrb[0].mxu0 %v308_v25 }
 0x110   : > { %v630_v27 = vpop.f32.mrb[0].mxu0 }
 0x111   : > { %v417_v28 = vadd.f32 %v630_v27, %v569_v26  ;;  %v391_v29 = vpop.f32.mrb[1].mxu0 }
 0x112   : > { %v416_v30 = vadd.f32 %v569_v26, %v391_v29 }
 0x113   : > { %419 = vst [vmem:[%s265_s19 + $0x8] sm:$0xff] %v417_v28 }
 0x114   : > { %418 = vst [vmem:[%s265_s19] sm:$0xff] %v416_v30 }
 0x115   : > { %733 = shalt.err (!%p730_p5)
}
 0x116   : > { %s734_s6 = scalar_lea.hbm %s923_s29, 256  ;;  %s738_s9 = scalar_lea.hbm %s974_s3, 1024 }
 0x117   : > { %p735_p6 = scmp.ne.s32.totalorder %s923_s29, %s734_s6  ;;  %p739_p10 = scmp.lt.u32.totalorder %s923_s29, %s974_s3 }
 0x118   : > { %p740_p11 = scmp.lt.u32.totalorder %s738_s9, %s734_s6  ;;  %p742_p13 = scmp.lt.u32.totalorder %s734_s6, %s923_s29 }
 0x119   : > { %p736_p7 = pnand %p735_p6, %p863_p4 }
 0x11a   : > { %p741_p12 = por %p740_p11, %p739_p10 }
 0x11b   : > { %p737_p9 = pneg %p736_p7 }
 0x11c   : > { %p743_p0 = por %p742_p13, %p741_p12 }
 0x11e   : > { %p744_p1 = pnand %p743_p0, %p737_p9 }
 0x120   : > { %747 = shalt.err (!%p744_p1)
}
 0x121   : > { %s801_s18 = smov 128   ;;  %s802_s19 = smov 8  }
 0x122   : > { %663 = dma.vmem_to_hbm [thread:$0]  (%p863_p4), %s918_s21, 256, %s923_s29, %s925_s26, %s801_s18, %s801_s18, %s802_s19  }
 0x123 PF: > { %p669_p2 = scmp.ge.s32.totalorder %s798_s17, 2  ;;  %s452_s23 = sand.u32 1, %s778_s12  }
 0x124   : > { %s453_s27 = scalar_lea.sflag [#allocation4], %s452_s23 }
 0x125   : > { %p666_p3 = pnand %p669_p2, %p870_p8 }
 0x127   : > { %773 = dma.done.wait (!%p666_p3), %s453_s27, 256  }
 0x128   : > { %775 = vsyncadd (!%p666_p3), %s453_s27, 4294967040  ;;  %s16_s17 = sadd.s32 1, %s798_s17   ;;  %s977_s12 = smov %s782_s13 }
 0x129   : > { %p13_p5 = scmp.ge.s32.totalorder %s16_s17, 6   ;;  %s978_s13 = smov %s786_s14 }
 0x12a   : > { %s979_s14 = smov %s876_s25  ;;  %s980_s15 = smov %s794_s16 }
 0x12b   : > { %s981_s16 = smov %s983_s20  ;;  %15 = sbr.rel (!%p13_p5) target bundleno = 4 (0x4), region = 81 }
 0x132   :  { %458 = vsyncpa [#allocation4], 1 }
 0x133   :  { %460 = vsyncpa [#allocation4 + $0x1], 1 }

</bundles_post_ra>
